<compile_context>
chip_gen: v6e
topology: v6e:2x2x1
jax: 0.10.0
libtpu: 0.0.40
codegen_flags: <defaults>
</compile_context>

<pallas_src>
import functools

import jax
import jax.numpy as jnp
from jax.experimental import pallas as pl
from jax.experimental.pallas import tpu as pltpu

_LANE = 128
_BN_EPS = 1e-5


def _pad_last(a, mult):
    pad = (-a.shape[-1]) % mult
    if pad:
        a = jnp.pad(a, [(0, 0)] * (a.ndim - 1) + [(0, pad)])
    return a


def _pad_2d(a, row_mult, col_mult):
    pr = (-a.shape[0]) % row_mult
    pc = (-a.shape[1]) % col_mult
    if pr or pc:
        a = jnp.pad(a, [(0, pr), (0, pc)])
    return a


def _use_bf16_activations():
    # bf16 tanh only where the VPU/EUP are bf16-capable (v6e / v7x); v5e and
    # unknown chips stay f32 (safe default).
    try:
        kind = jax.devices()[0].device_kind.lower()
    except Exception:  # pragma: no cover - defensive
        return False
    return ("v6" in kind) or ("v7" in kind) or ("tpu7" in kind)


def _mlp_bn_kernel(r_ref, w1_ref, b1_ref, w2_ref, gamma_ref, beta_ref,
                   w3_hbm, b3_ref, o_ref, w3_vmem, w3_sem, *, use_bf16_act):
    # Hide the dominant HBM transfer (w3) behind layers 1-2 + BatchNorm: start
    # the DMA now, block on it only right before the final matmul.
    w3_copy = pltpu.make_async_copy(w3_hbm, w3_vmem, w3_sem)
    w3_copy.start()

    x = r_ref[...]                                              # (B, 1) f32

    # Linear(1, H) + Tanh.  K=1 contraction expressed as a broadcast FMA
    # (identical math to x @ W1, avoids a degenerate K=1 MXU matmul).
    pre1 = x * w1_ref[...] + b1_ref[...]                        # (B, Hp) f32
    if use_bf16_act:
        h1 = jnp.tanh(pre1.astype(jnp.bfloat16))                # bf16 EUP tanh
    else:
        h1 = jnp.tanh(pre1).astype(jnp.bfloat16)                # f32 tanh (v5e)

    # Linear(H, 2H): bf16 x bf16 on the MXU, f32 accumulate.  Bias b2 is
    # intentionally omitted: training-mode BatchNorm subtracts the batch mean,
    # which cancels any per-feature constant exactly.
    h2 = jnp.dot(h1, w2_ref[...], preferred_element_type=jnp.float32)  # (B, H2p)

    # BatchNorm1d(2H), training mode, single pass: accumulate E[x] and E[x^2]
    # together (f32), biased var = E[x^2] - mean^2 (clamped), and fold gamma,
    # the rsqrt and the mean shift into one per-feature scale/shift so the
    # (B, 2H) tensor sees exactly one FMA before the tanh.
    inv_b = 1.0 / h2.shape[0]
    mean = jnp.sum(h2, axis=0, keepdims=True) * inv_b           # (1, H2p)
    ex2 = jnp.sum(h2 * h2, axis=0, keepdims=True) * inv_b       # (1, H2p)
    var = jnp.maximum(ex2 - mean * mean, 0.0)
    scale = gamma_ref[...] * jax.lax.rsqrt(var + _BN_EPS)       # (1, H2p)
    shift = beta_ref[...] - mean * scale                        # (1, H2p)
    pre2 = h2 * scale + shift                                   # (B, H2p) f32
    if use_bf16_act:
        h3 = jnp.tanh(pre2.astype(jnp.bfloat16))
    else:
        h3 = jnp.tanh(pre2).astype(jnp.bfloat16)

    # Linear(2H, O): the w3 DMA has been in flight the whole time.
    w3_copy.wait()
    out = jnp.dot(h3, w3_vmem[...], preferred_element_type=jnp.float32)  # (B, Op)
    o_ref[...] = out + b3_ref[...]                              # lane-dense store


def processing_layers_pallas(roundness, params):
    """roundness: (B, 1) f32.  Returns bytes_logits (B, O) f32.

    Equivalent to nn.Sequential(Linear(1,H), Tanh, Linear(H,2H),
    BatchNorm1d(2H), Tanh, Linear(2H,O)) with BatchNorm in training mode
    (the module default at call time).
    """
    w1, b1, w2, b2, gamma, beta, w3, b3 = params
    del b2  # cancelled exactly by training-mode BatchNorm's mean subtraction
    B = roundness.shape[0]
    O = w3.shape[1]

    # Lane-dense (multiple-of-128) feature dims.  Pads are exact zeros, and
    # gamma/beta pads of 0 keep the padded BN features at 0 (no NaN from var=0);
    # padded w3 rows are 0 so they never contribute to the output.
    w1p = _pad_last(w1, _LANE)                                  # (1, Hp)   f32
    b1p = _pad_last(b1, _LANE)                                  # (1, Hp)   f32
    w2p = _pad_2d(w2, _LANE, _LANE).astype(jnp.bfloat16)        # (Hp, H2p) bf16
    gammap = _pad_last(gamma, _LANE)                            # (1, H2p)  f32
    betap = _pad_last(beta, _LANE)                              # (1, H2p)  f32
    w3p = _pad_2d(w3, _LANE, _LANE).astype(jnp.bfloat16)        # (H2p, Op) bf16
    b3p = _pad_last(b3, _LANE)                                  # (1, Op)   f32
    Hp, H2p = w2p.shape
    Op = w3p.shape[1]

    use_bf16_act = _use_bf16_activations()

    # Explicit scoped-VMEM budget: inputs + output + the w3 scratch copy plus
    # headroom for the (B, features) temporaries; capped at 64 MiB (v7x-safe).
    def nbytes(a):
        return int(a.size) * a.dtype.itemsize
    io_bytes = sum(map(nbytes, (roundness, w1p, b1p, w2p, gammap, betap, w3p, b3p)))
    io_bytes += B * Op * 4                                      # f32 output
    scratch_bytes = H2p * Op * 2                                # bf16 w3 copy
    act_bytes = B * (6 * Hp + 10 * H2p + 4 * Op)                # generous temps
    vmem_limit = max(4 << 20,
                     min(io_bytes + scratch_bytes + act_bytes + (2 << 20), 64 << 20))

    vmem = pl.BlockSpec(memory_space=pltpu.MemorySpace.VMEM)
    hbm = pl.BlockSpec(memory_space=pl.ANY)   # w3 stays in HBM; copied manually
    out = pl.pallas_call(
        functools.partial(_mlp_bn_kernel, use_bf16_act=use_bf16_act),
        out_shape=jax.ShapeDtypeStruct((B, Op), jnp.float32),
        in_specs=[vmem, vmem, vmem, vmem, vmem, vmem, hbm, vmem],
        out_specs=vmem,
        scratch_shapes=[pltpu.VMEM((H2p, Op), jnp.bfloat16),
                        pltpu.SemaphoreType.DMA(())],
        compiler_params=pltpu.CompilerParams(vmem_limit_bytes=int(vmem_limit)),
    )(roundness, w1p, b1p, w2p, gammap, betap, w3p, b3p)
    # TODO(synk): for large batches (thousands of rows) switch to a two-phase,
    # batch-tiled grid (phase 0: BN sum/sumsq per batch tile into a (2, H2p)
    # scratch; phase 1: normalize + Linear(2H,O) per tile, output dim split
    # 'parallel' so v7x's second TensorCore is used) instead of whole-array
    # residency.
    return out[:, :O]


def xavier_uniform(key, fan_in, fan_out):
    limit = (6.0 / (fan_in + fan_out)) ** 0.5
    # Stored as (in, out): same distribution as PyTorch's (out, in) weight.
    return jax.random.uniform(key, (fan_in, fan_out), jnp.float32, -limit, limit)


def init_params(key, hidden_dim, output_dim):
    k1, k2, k3, k4, k5, k6 = jax.random.split(key, 6)
    H, H2, O = hidden_dim, hidden_dim * 2, output_dim
    w1 = xavier_uniform(k1, 1, H)
    b1 = jax.random.uniform(k2, (1, H), jnp.float32, -1.0, 1.0)   # fan_in=1 bound
    w2 = xavier_uniform(k3, H, H2)
    b2 = jax.random.uniform(k4, (1, H2), jnp.float32,
                            -1.0 / H ** 0.5, 1.0 / H ** 0.5)
    gamma = jnp.ones((1, H2), jnp.float32)                         # BN defaults
    beta = jnp.zeros((1, H2), jnp.float32)
    w3 = xavier_uniform(k5, H2, O)
    b3 = jax.random.uniform(k6, (1, O), jnp.float32,
                            -1.0 / H2 ** 0.5, 1.0 / H2 ** 0.5)
    return (w1, b1, w2, b2, gamma, beta, w3, b3)


def roundness_to_text_forward(roundness, params):
    """Pallas-backed equivalent of RoundnessToTextModel.forward up to the T5 call.

    Returns dict with `bytes_logits` (B, O) and `inputs_embeds` (B, 1, O).
    """
    bytes_logits = processing_layers_pallas(roundness, params)
    inputs_embeds = bytes_logits[:, None, :]   # .unsqueeze(1)
    # TODO(synk): pretrained T5ForConditionalGeneration decode + SyllableTokenizer
    # have no Pallas equivalent (external checkpoint, autoregressive sampling).
    return {"bytes_logits": bytes_logits, "inputs_embeds": inputs_embeds,
            "generated_text": None, "loss": None}


if __name__ == "__main__":
    batch = 8
    hidden_dim = 32          # small stand-in for the default 256
    output_dim = 96          # small, non-multiple-of-128 to exercise lane padding

    key = jax.random.PRNGKey(0)
    k_in, k_par = jax.random.split(key)
    roundness = jax.random.uniform(k_in, (batch, 1), jnp.float32)  # [B, 1]
    params = init_params(k_par, hidden_dim, output_dim)

    out = roundness_to_text_forward(roundness, params)
    logits = jax.block_until_ready(out["bytes_logits"])
    embeds = jax.block_until_ready(out["inputs_embeds"])

    # Pure-JAX reference: full module math (including b2 — verifying that
    # training-mode BN cancels it), two-pass BN moments, the same bf16 weight
    # storage and the same activation precision the kernel uses on this chip.
    use_bf16_act = _use_bf16_activations()

    def act(pre):
        return jnp.tanh(pre.astype(jnp.bfloat16)) if use_bf16_act else jnp.tanh(pre)

    w1, b1, w2, b2, gamma, beta, w3, b3 = params
    h1 = act(roundness * w1 + b1)
    h2 = jnp.dot(h1.astype(jnp.bfloat16), w2.astype(jnp.bfloat16),
                 preferred_element_type=jnp.float32) + b2
    mean = h2.mean(0, keepdims=True)
    var = ((h2 - mean) ** 2).mean(0, keepdims=True)
    h3 = act((h2 - mean) * jax.lax.rsqrt(var + _BN_EPS) * gamma + beta)
    ref = jnp.dot(h3.astype(jnp.bfloat16), w3.astype(jnp.bfloat16),
                  preferred_element_type=jnp.float32) + b3

    assert logits.shape == (batch, output_dim)
    assert embeds.shape == (batch, 1, output_dim)
    assert jnp.allclose(logits, ref, atol=2e-2, rtol=2e-2), (
        float(jnp.max(jnp.abs(logits - ref))))

    print("KERNEL_OK")
</pallas_src>

<mosaic_0001>
module attributes {stable_mosaic.version = 11 : i64} {
  func.func @_mlp_bn_kernel(%arg0: memref<8x1xf32, #tpu.memory_space<vmem>>, %arg1: memref<1x128xf32, #tpu.memory_space<vmem>>, %arg2: memref<1x128xf32, #tpu.memory_space<vmem>>, %arg3: memref<128x128xbf16, #tpu.memory_space<vmem>>, %arg4: memref<1x128xf32, #tpu.memory_space<vmem>>, %arg5: memref<1x128xf32, #tpu.memory_space<vmem>>, %arg6: memref<128x128xbf16, #tpu.memory_space<any>>, %arg7: memref<1x128xf32, #tpu.memory_space<vmem>>, %arg8: memref<8x128xf32, #tpu.memory_space<vmem>>, %arg9: memref<128x128xbf16, #tpu.memory_space<vmem>>, %arg10: memref<!tpu.dma_semaphore, #tpu.memory_space<semaphore_mem>>) attributes {dimension_semantics = [], scalar_prefetch = 0 : i64, scratch_operands = 2 : i64, tpu.core_type = #tpu.core_type<tc>} {
    tpu.enqueue_dma source(%arg6 : memref<128x128xbf16, #tpu.memory_space<any>>) target(%arg9 : memref<128x128xbf16, #tpu.memory_space<vmem>>) target_semaphore(%arg10 : memref<!tpu.dma_semaphore, #tpu.memory_space<semaphore_mem>>)
    %c0 = arith.constant 0 : index
    %c0_0 = arith.constant 0 : index
    %0 = vector.load %arg0[%c0, %c0_0] : memref<8x1xf32, #tpu.memory_space<vmem>>, vector<8x1xf32>
    %c0_1 = arith.constant 0 : index
    %c0_2 = arith.constant 0 : index
    %1 = vector.load %arg1[%c0_1, %c0_2] : memref<1x128xf32, #tpu.memory_space<vmem>>, vector<1x128xf32>
    %2 = vector.broadcast %0 : vector<8x1xf32> to vector<8x128xf32>
    %3 = vector.broadcast %1 : vector<1x128xf32> to vector<8x128xf32>
    %4 = arith.mulf %2, %3 : vector<8x128xf32>
    %c0_3 = arith.constant 0 : index
    %c0_4 = arith.constant 0 : index
    %5 = vector.load %arg2[%c0_3, %c0_4] : memref<1x128xf32, #tpu.memory_space<vmem>>, vector<1x128xf32>
    %6 = vector.broadcast %5 : vector<1x128xf32> to vector<8x128xf32>
    %7 = arith.addf %4, %6 : vector<8x128xf32>
    %8 = math.tanh %7 : vector<8x128xf32>
    %9 = arith.truncf %8 : vector<8x128xf32> to vector<8x128xbf16>
    %c0_5 = arith.constant 0 : index
    %c0_6 = arith.constant 0 : index
    %10 = vector.load %arg3[%c0_5, %c0_6] : memref<128x128xbf16, #tpu.memory_space<vmem>>, vector<128x128xbf16>
    %cst = arith.constant dense<0.000000e+00> : vector<8x128xf32>
    %11 = tpu.matmul %9, %10, %cst {dimension_numbers = #tpu.dot_dimension_numbers<[1], [0], [0], [1], [0, 0, 1, 1], [], []>} : vector<8x128xbf16>, vector<128x128xbf16>, vector<8x128xf32> -> vector<8x128xf32>
    %cst_7 = arith.constant dense<0.000000e+00> : vector<128xf32>
    %12 = vector.multi_reduction <add>, %11, %cst_7 [0] : vector<8x128xf32> to vector<128xf32>
    %13 = vector.shape_cast %12 : vector<128xf32> to vector<1x128xf32>
    %cst_8 = arith.constant 1.250000e-01 : f32
    %14 = vector.broadcast %cst_8 : f32 to vector<1x128xf32>
    %15 = arith.mulf %13, %14 : vector<1x128xf32>
    %16 = arith.mulf %11, %11 : vector<8x128xf32>
    %cst_9 = arith.constant dense<0.000000e+00> : vector<128xf32>
    %17 = vector.multi_reduction <add>, %16, %cst_9 [0] : vector<8x128xf32> to vector<128xf32>
    %18 = vector.shape_cast %17 : vector<128xf32> to vector<1x128xf32>
    %cst_10 = arith.constant 1.250000e-01 : f32
    %19 = vector.broadcast %cst_10 : f32 to vector<1x128xf32>
    %20 = arith.mulf %18, %19 : vector<1x128xf32>
    %21 = arith.mulf %15, %15 : vector<1x128xf32>
    %22 = arith.subf %20, %21 : vector<1x128xf32>
    %cst_11 = arith.constant 0.000000e+00 : f32
    %23 = vector.broadcast %cst_11 : f32 to vector<1x128xf32>
    %24 = arith.maximumf %22, %23 : vector<1x128xf32>
    %c0_12 = arith.constant 0 : index
    %c0_13 = arith.constant 0 : index
    %25 = vector.load %arg4[%c0_12, %c0_13] : memref<1x128xf32, #tpu.memory_space<vmem>>, vector<1x128xf32>
    %cst_14 = arith.constant 9.99999974E-6 : f32
    %26 = vector.broadcast %cst_14 : f32 to vector<1x128xf32>
    %27 = arith.addf %24, %26 : vector<1x128xf32>
    %28 = math.rsqrt %27 : vector<1x128xf32>
    %29 = arith.mulf %25, %28 : vector<1x128xf32>
    %c0_15 = arith.constant 0 : index
    %c0_16 = arith.constant 0 : index
    %30 = vector.load %arg5[%c0_15, %c0_16] : memref<1x128xf32, #tpu.memory_space<vmem>>, vector<1x128xf32>
    %31 = arith.mulf %15, %29 : vector<1x128xf32>
    %32 = arith.subf %30, %31 : vector<1x128xf32>
    %33 = vector.broadcast %29 : vector<1x128xf32> to vector<8x128xf32>
    %34 = arith.mulf %11, %33 : vector<8x128xf32>
    %35 = vector.broadcast %32 : vector<1x128xf32> to vector<8x128xf32>
    %36 = arith.addf %34, %35 : vector<8x128xf32>
    %37 = math.tanh %36 : vector<8x128xf32>
    %38 = arith.truncf %37 : vector<8x128xf32> to vector<8x128xbf16>
    tpu.wait_dma2 semaphore(%arg10 : memref<!tpu.dma_semaphore, #tpu.memory_space<semaphore_mem>>) src(%arg6 : memref<128x128xbf16, #tpu.memory_space<any>>) dst(%arg9 : memref<128x128xbf16, #tpu.memory_space<vmem>>)
    %c0_17 = arith.constant 0 : index
    %c0_18 = arith.constant 0 : index
    %39 = vector.load %arg9[%c0_17, %c0_18] : memref<128x128xbf16, #tpu.memory_space<vmem>>, vector<128x128xbf16>
    %cst_19 = arith.constant dense<0.000000e+00> : vector<8x128xf32>
    %40 = tpu.matmul %38, %39, %cst_19 {dimension_numbers = #tpu.dot_dimension_numbers<[1], [0], [0], [1], [0, 0, 1, 1], [], []>} : vector<8x128xbf16>, vector<128x128xbf16>, vector<8x128xf32> -> vector<8x128xf32>
    %c0_20 = arith.constant 0 : index
    %c0_21 = arith.constant 0 : index
    %41 = vector.load %arg7[%c0_20, %c0_21] : memref<1x128xf32, #tpu.memory_space<vmem>>, vector<1x128xf32>
    %42 = vector.broadcast %41 : vector<1x128xf32> to vector<8x128xf32>
    %43 = arith.addf %40, %42 : vector<8x128xf32>
    %c0_22 = arith.constant 0 : index
    %c0_23 = arith.constant 0 : index
    %44 = vector.load %arg8[%c0_22, %c0_23] : memref<8x128xf32, #tpu.memory_space<vmem>>, vector<8x128xf32>
    tpu.vector_store %arg8[%c0_22, %c0_23], %43 {strides = array<i32>} : memref<8x128xf32, #tpu.memory_space<vmem>>, vector<8x128xf32>,
    return
  }
}

</mosaic_0001>

<bundles_post_ra>
// kernel: tpu_custom_call.1
= control target key start
LH: loop header
LB: loop body
LE: loop exit
PB: predicated region body
PF: predicated region fallthrough
CT: control target
= control target key end

     0   :  { %13 = vsyncpa [#allocation5], 0  ;;  %s635_s0 = inlined_call_operand.vmem [shape: f32[8,1], index: 0, kind: input, shape index: {}]   ;;  %s636_s1 = inlined_call_operand.vmem [shape: f32[1,128], index: 1, kind: input, shape index: {}]   ;;  %s637_s2 = inlined_call_operand.vmem [shape: f32[1,128], index: 2, kind: input, shape index: {}]   ;;  %s638_s3 = inlined_call_operand.hbm [shape: bf16[128,128], index: 3, kind: input, shape index: {}]   ;;  %s639_s4 = inlined_call_operand.vmem [shape: f32[1,128], index: 4, kind: input, shape index: {}]   ;;  %s640_s5 = inlined_call_operand.vmem [shape: f32[1,128], index: 5, kind: input, shape index: {}]   ;;  %s641_s6 = inlined_call_operand.hbm [shape: bf16[128,128], index: 6, kind: input, shape index: {}]   ;;  %s642_s7 = inlined_call_operand.vmem [shape: f32[1,128], index: 7, kind: input, shape index: {}]   ;;  %s643_s8 = inlined_call_operand.hbm [shape: f32[8,128], index: 8, kind: output, shape index: {}]  }
   0x1   :  { %14 = vsyncpa [#allocation6], 0  ;;  %s535_s27 = smov [#allocation4]  }
   0x2   :  { %s26_s28 = sshll.u32 %s535_s27, 4  ;;  %s27_s28 = int_to_ptr.vmem [resolvable:$true] %s26_s28 }
   0x3   :  { %s477_s29 = scalar_lea.vmem %s27_s28, 1024  ;;  %p482_p1 = scmp.lt.s32.totalorder %s27_s28, %s27_s28 }
   0x4   :  { %p478_p0 = scmp.ne.s32.totalorder %s27_s28, %s477_s29  ;;  %p483_p2 = scmp.lt.s32.totalorder %s477_s29, %s477_s29 }
   0x6   :  { %p484_p3 = por %p483_p2, %p482_p1 }
   0x8   :  { %p485_p4 = pnand %p484_p3, %p478_p0 }
   0xa   :  { %488 = shalt.err (!%p485_p4)
}
   0xb   :  { %s536_s30 = smov 64   ;;  %s537_s9 = smov 4  }
   0xc   :  { %32 = dma.hbm_to_vmem [thread:$0]  %s638_s3, 1024, %s27_s28, [#allocation5], %s536_s30, %s536_s30, %s537_s9  }
   0xd   :  { %529 = dma.done.wait [#allocation5], 1024  }
   0xe   :  { %530 = vsyncadd [#allocation5], 4294966272  ;;  %v538_v0 = vmov 0   ;;  %v539_v1 = vmov 0.0   ;;  %v54_v2 = vld [vmem:[%s635_s0] sm:$0xff]  ;;  %v447_v3 = vld [vmem:[#allocation4 + $0x38] sm:$0xff]  }
   0xf   :  { %446 = vset.pattern.permute.xlu0 %v538_v0  ;;  %398 = vmatprep.subr.bf16.mxu0 %v539_v1  ;;  %vm540_vm0 = vmmov 0   ;;  %v448_v4 = vld [vmem:[#allocation4 + $0x30] sm:$0xff]   ;;  %v449_v5 = vld [vmem:[#allocation4 + $0x28] sm:$0xff]   ;;  %v450_v6 = vld [vmem:[#allocation4 + $0x20] sm:$0xff]   ;;  %s541_s16 = smov [#allocation2]  }
  0x10   :  { %58 = vperm.xlu0 %446, %v54_v2   ;;  %414 = vmatprep.mubr.msk.bf16.mxu0 %vm540_vm0, %v539_v1  ;;  %v451_v7 = vld [vmem:[#allocation4 + $0x18] sm:$0xff]   ;;  %v452_v8 = vld [vmem:[#allocation4 + $0x10] sm:$0xff]   ;;  %v453_v9 = vld [vmem:[#allocation4 + $0x8] sm:$0xff]   ;;  %s50_s17 = sshll.u32 %s541_s16, 4  ;;  %s51_s17 = int_to_ptr.vmem [resolvable:$true] %s50_s17 }
  0x11   :  { %399 = vmatpush3.bf16.msra.mxu0 %v447_v3  ;;  %v454_v10 = vld [vmem:[#allocation4] sm:$0xff]   ;;  %s497_s18 = scalar_lea.vmem %s51_s17, 1024  ;;  %p502_p6 = scmp.lt.s32.totalorder %s51_s17, %s51_s17 }
  0x12   :  { %400 = vmatprep.subr.bf16.mxu0 %v539_v1  ;;  %v360_v11 = vld [vmem:[%s636_s1] ss:$0 sm:$0xff]  ;;  %p498_p5 = scmp.ne.s32.totalorder %s51_s17, %s497_s18  ;;  %p503_p7 = scmp.lt.s32.totalorder %s497_s18, %s497_s18 }
  0x13   :  { %v361_v12 = vld [vmem:[%s637_s2] ss:$0 sm:$0xff] }
  0x14   :  { %p504_p8 = por %p503_p7, %p502_p6 }
  0x15   :  { %401 = vmatpush3.bf16.msra.mxu0 %v448_v4 }
  0x16   :  { %402 = vmatprep.subr.bf16.mxu0 %v539_v1  ;;  %p505_p9 = pnand %p504_p8, %p498_p5 }
  0x19   :  { %403 = vmatpush3.bf16.msra.mxu0 %v449_v5 }
  0x1a   :  { %404 = vmatprep.subr.bf16.mxu0 %v539_v1 }
  0x1d   :  { %405 = vmatpush3.bf16.msra.mxu0 %v450_v6 }
  0x1e   :  { %406 = vmatprep.subr.bf16.mxu0 %v539_v1 }
  0x21   :  { %407 = vmatpush3.bf16.msra.mxu0 %v451_v7 }
  0x22   :  { %408 = vmatprep.subr.bf16.mxu0 %v539_v1 }
  0x25   :  { %409 = vmatpush3.bf16.msra.mxu0 %v452_v8 }
  0x26   :  { %410 = vmatprep.subr.bf16.mxu0 %v539_v1 }
  0x29   :  { %411 = vmatpush3.bf16.msra.mxu0 %v453_v9 }
  0x2a   :  { %412 = vmatprep.subr.bf16.mxu0 %v539_v1 }
  0x2d   :  { %413 = vmatpush3.bf16.msra.mxu0 %v454_v10 }
  0x8b   :  { %v59_v13 = vpop.permute.xlu0 %58 }
  0x8c   :  { %v67_v14 = vmul.f32 %v360_v11, %v59_v13 }
  0x8e   :  { %v75_v15 = vadd.f32 %v361_v12, %v67_v14 }
  0x90   :  { %455 = vtanh.f32 %v75_v15 }
  0x9d   :  { %v456_v16 = vpop.eup %455 }
  0x9e   :  { %v77_v17 = vpack.c.bf16 %v456_v16, %v456_v16 }
  0xa0   :  { %415 = vmatmul.mubr.bf16.vlgmr.msra.gmra.mxu0 %v77_v17 }
  0xa1   :  { %508 = shalt.err (!%p505_p9)  }
  0xa2   :  { %53 = dma.hbm_to_vmem [thread:$0]  %s641_s6, 1024, %s51_s17, [#allocation3]  ;;  %v208_v41 = vlaneseq  ;;  %v200_v43 = vld [vmem:[%s639_s4] sm:$0x1] }
  0xa3   :  { %v204_v47 = vld [vmem:[%s640_s5] sm:$0x1] }
  0xa4   :  { %v209_v42 = vshrl.u32 %v208_v41, 7 }
  0xa6   :  { %v210_v44 = vsub.s32 0, %v209_v42 }
 0x160   :  { %v176_v18 = vpop.f32.mrf.mxu0 }
 0x161   :  { %v182_v19 = vrot.slane %v176_v18, 4  ;;  %v189_v20 = vmul.f32 %v176_v18, %v176_v18 }
 0x162   :  { %v416_v21 = vpop.f32.mrf.mxu0 }
 0x163   :  { %v183_v22 = vadd.f32 %v182_v19, %v176_v18  ;;  %v190_v23 = vrot.slane %v189_v20, 4 }
 0x164   :  { %v179_v24 = vpop.f32.mrf.mxu0 }
 0x165   :  { %v184_v25 = vrot.slane %v183_v22, 2  ;;  %v191_v26 = vadd.f32 %v190_v23, %v189_v20 }
 0x166   :  { %v417_v27 = vpop.f32.mrf.mxu0 }
 0x167   :  { %v185_v28 = vadd.f32 %v184_v25, %v183_v22  ;;  %v192_v29 = vrot.slane %v191_v26, 2 }
 0x169   :  { %v186_v30 = vrot.slane %v185_v28, 1  ;;  %v193_v31 = vadd.f32 %v192_v29, %v191_v26 }
 0x16b   :  { %v187_v32 = vadd.f32 %v186_v30, %v185_v28  ;;  %v194_v33 = vrot.slane %v193_v31, 1 }
 0x16d   :  { %v188_v34 = vmul.f32 0.125, %v187_v32  ;;  %v195_v35 = vadd.f32 %v194_v33, %v193_v31 }
 0x16f   :  { %v196_v36 = vmul.f32 0.125, %v195_v35  ;;  %v197_v37 = vmul.f32 %v188_v34, %v188_v34 }
 0x171   :  { %v198_v38 = vsub.f32 %v196_v36, %v197_v37 }
 0x173   :  { %v199_v39 = vmax.f32 %v198_v38, 0.0 }
 0x175   :  { %v201_v40 = vadd.f32 1e-05, %v199_v39 }
 0x177   :  { %457 = vrsqrt.f32 %v201_v40 }
 0x184   :  { %v458_v45 = vpop.eup %457 }
 0x185   :  { %v203_v46 = vmul.f32 %v458_v45, %v200_v43 }
 0x187   :  { %v205_v48 = vmul.f32 %v203_v46, %v188_v34  ;;  %v211_v49 = vrot.slane %v203_v46, %v210_v44 }
 0x189   :  { %v206_v50 = vsub.f32 %v204_v47, %v205_v48  ;;  %v213_v51 = vmul.f32 %v211_v49, %v176_v18 }
 0x18b   :  { %v218_v52 = vrot.slane %v206_v50, %v210_v44 }
 0x18d   :  { %v220_v53 = vadd.f32 %v218_v52, %v213_v51 }
 0x18f   :  { %459 = vtanh.f32 %v220_v53 }
 0x19c   :  { %v460_v54 = vpop.eup %459 }
 0x19d   :  { %v222_v55 = vpack.c.bf16 %v460_v54, %v460_v54 }
 0x19e   :  { %531 = dma.done.wait [#allocation3], 1024 }
 0x19f   :  { %532 = vsyncadd [#allocation3], 4294966272  ;;  %418 = vmatprep.subr.bf16.mxu1 %v539_v1  ;;  %434 = vmatprep.mubr.msk.bf16.mxu1 %vm540_vm0, %v539_v1  ;;  %v461_v56 = vld [vmem:[#allocation2 + $0x38] sm:$0xff]   ;;  %v462_v57 = vld [vmem:[#allocation2 + $0x30] sm:$0xff]   ;;  %s542_s22 = smov [#allocation7]  }
 0x1a0   :  { %419 = vmatpush3.bf16.msra.mxu1 %v461_v56  ;;  %v463_v58 = vld [vmem:[#allocation2 + $0x28] sm:$0xff]   ;;  %v464_v59 = vld [vmem:[#allocation2 + $0x20] sm:$0xff]   ;;  %v465_v60 = vld [vmem:[#allocation2 + $0x18] sm:$0xff]   ;;  %s345_s23 = sshll.u32 %s542_s22, 4  ;;  %s346_s23 = int_to_ptr.vmem [resolvable:$true] %s345_s23 }
 0x1a1   :  { %420 = vmatprep.subr.bf16.mxu1 %v539_v1  ;;  %v466_v61 = vld [vmem:[#allocation2 + $0x10] sm:$0xff]   ;;  %v467_v62 = vld [vmem:[#allocation2 + $0x8] sm:$0xff]   ;;  %v468_v63 = vld [vmem:[#allocation2] sm:$0xff]   ;;  %s509_s24 = scalar_lea.vmem %s346_s23, 128  ;;  %p514_p11 = scmp.lt.s32.totalorder %s346_s23, %s346_s23 }
 0x1a2   :  { %v370_v0 = vld [vmem:[%s642_s7] ss:$0 sm:$0xff]  ;;  %p510_p10 = scmp.ne.s32.totalorder %s346_s23, %s509_s24  ;;  %p515_p12 = scmp.lt.s32.totalorder %s509_s24, %s509_s24 }
 0x1a4   :  { %421 = vmatpush3.bf16.msra.mxu1 %v462_v57  ;;  %p516_p13 = por %p515_p12, %p514_p11 }
 0x1a5   :  { %422 = vmatprep.subr.bf16.mxu1 %v539_v1 }
 0x1a6   :  { %p517_p0 = pnand %p516_p13, %p510_p10 }
 0x1a8   :  { %423 = vmatpush3.bf16.msra.mxu1 %v463_v58 }
 0x1a9   :  { %424 = vmatprep.subr.bf16.mxu1 %v539_v1 }
 0x1ac   :  { %425 = vmatpush3.bf16.msra.mxu1 %v464_v59 }
 0x1ad   :  { %426 = vmatprep.subr.bf16.mxu1 %v539_v1 }
 0x1b0   :  { %427 = vmatpush3.bf16.msra.mxu1 %v465_v60 }
 0x1b1   :  { %428 = vmatprep.subr.bf16.mxu1 %v539_v1 }
 0x1b4   :  { %429 = vmatpush3.bf16.msra.mxu1 %v466_v61 }
 0x1b5   :  { %430 = vmatprep.subr.bf16.mxu1 %v539_v1 }
 0x1b8   :  { %431 = vmatpush3.bf16.msra.mxu1 %v467_v62 }
 0x1b9   :  { %432 = vmatprep.subr.bf16.mxu1 %v539_v1 }
 0x1bc   :  { %433 = vmatpush3.bf16.msra.mxu1 %v468_v63 }
 0x1bf   :  { %435 = vmatmul.mubr.bf16.vlgmr.msra.gmra.mxu1 %v222_v55 }
 0x27f   :  { %v332_v2 = vpop.f32.mrf.mxu1 }
 0x280   :  { %v333_v3 = vadd.f32 %v370_v0, %v332_v2 }
 0x281   :  { %v436_v4 = vpop.f32.mrf.mxu1 }
 0x282   :  { %338 = vst [vmem:[#allocation7] sm:$0xff] %v333_v3 }
 0x283   :  { %v335_v5 = vpop.f32.mrf.mxu1 }
 0x284   :  { %520 = shalt.err (!%p517_p0)
}
 0x285   :  { %348 = dma.vmem_to_hbm [thread:$0]  %s346_s23, 128, %s643_s8, [#allocation6]   ;;  %v437_v1 = vpop.f32.mrf.mxu1 }
 0x286   :  { %533 = dma.done.wait [#allocation6], 128  }
 0x287   :  { %534 = vsyncadd [#allocation6], 4294967168 }
 0x288   :  { %352 = vsyncpa [#allocation5], 1 }
 0x289   :  { %353 = vsyncpa [#allocation6], 1 }
 0x28a   :  { %354 = vsyncmov [#allocation3] }
 0x28d   :  { %s355_s7 = vpop.sfrf %354 }
 0x28e   :  { %p379_p1 = scmp.ne.s32.totalorder %s355_s7, 0 }
 0x290   :  { %359 = shalt.err (%p379_p1)  }

</bundles_post_ra>
